<compile_context>
chip_gen: v7x
topology: tpu7x:2x2x1
jax: 0.10.0
libtpu: 0.0.40
codegen_flags: <defaults>
</compile_context>

<pallas_src>
import functools

import jax
import jax.numpy as jnp
from jax import lax
from jax.experimental import pallas as pl
from jax.experimental.pallas import tpu as pltpu


# ---------------------------------------------------------------------------
# small helpers
# ---------------------------------------------------------------------------
def _round_up(x, m):
    return ((x + m - 1) // m) * m


def _divisors(n):
    return [d for d in range(1, n + 1) if n % d == 0]


def _num_tensorcores():
    """Best-effort TensorCore count (v7x has 2 per chip); defaults to 1."""
    try:
        info = pltpu.get_tpu_info()
        for attr in ("num_cores", "num_tensorcores", "tensorcores_per_chip",
                     "cores_per_chip", "core_count"):
            v = getattr(info, attr, None)
            if isinstance(v, int) and v > 0:
                return v
    except Exception:
        pass
    return 1


def _choose_group(new_len, pw, max_group=64):
    """Group g windows per lane-row so the last dim is a multiple of 128 lanes.

    Returns the smallest divisor g of new_len with (g*pw) % 128 == 0 (capped),
    or 1 if no such divisor exists (last dim then stays full-extent)."""
    if pw % 128 == 0:
        return 1
    for d in _divisors(new_len):
        if d <= max_group and (d * pw) % 128 == 0:
            return d
    return 1


def _choose_rows_per_block(R, row_pad_bytes, sublane, batch, want_steps,
                           max_block_bytes):
    """Rows per grid step: divides R; full extent OR sublane-multiple; block
    budgeted with PADDED bytes; keep >= want_steps total grid steps when that
    keeps blocks >= 256 KiB."""
    valid = [d for d in _divisors(R) if d == R or d % sublane == 0]
    under = [d for d in valid
             if _round_up(d, sublane) * row_pad_bytes <= max_block_bytes]
    cand = under if under else [min(valid)]
    r_blk = max(cand)
    if batch * (R // r_blk) < want_steps:
        ok = [d for d in cand
              if batch * (R // d) >= want_steps
              and _round_up(d, sublane) * row_pad_bytes >= (256 << 10)]
        if ok:
            r_blk = max(ok)
    return r_blk


def _choose_chunk_rows(r_blk, row_pad_bytes, sublane, chunk_bytes):
    """Rows per in-kernel chunk: divides r_blk, ~chunk_bytes of padded data,
    preferring sublane-aligned chunk boundaries."""
    limit = max(1, chunk_bytes // row_pad_bytes)
    divs = [d for d in _divisors(r_blk) if d <= limit]
    if not divs:
        return 1
    pref = [d for d in divs if d % sublane == 0]
    return max(pref) if pref else max(divs)


# ---------------------------------------------------------------------------
# kernel
# ---------------------------------------------------------------------------
def _unfold_kernel(x_ref, o_ref, *, g, period, nfeat, ch):
    """One grid step: permute r_blk lane-rows of one batch element.

    x_ref / o_ref: (1, r_blk, W) with W = g * period * nfeat.
    Each row holds g windows of period*nfeat contiguous lanes; within every
    window the (p, f) order is rewritten to (f, p):
        o[0, r, j*pw + f*period + p] = x[0, r, j*pw + p*nfeat + f]
    """
    r_blk = x_ref.shape[1]
    pw = period * nfeat
    n_chunks = r_blk // ch

    def permute(w):
        # (ch, period*nfeat) -> (ch, nfeat*period): per-window minor transpose.
        if period == 1 or nfeat == 1:
            return w  # permutation is the identity
        t = jnp.transpose(w.reshape(ch, period, nfeat), (0, 2, 1))
        return t.reshape(ch, pw)

    def process(r0):
        if g == 1:
            row = permute(x_ref[0, pl.ds(r0, ch), :])
        else:
            parts = [permute(x_ref[0, pl.ds(r0, ch), j * pw:(j + 1) * pw])
                     for j in range(g)]
            row = jnp.concatenate(parts, axis=-1)
        # One full-width, lane-dense store per chunk (no per-feature vst.msk).
        o_ref[0, pl.ds(r0, ch), :] = row

    if n_chunks <= 8:
        for c in range(n_chunks):          # fully unrolled, static
            process(c * ch)
    else:
        def body(c, carry):
            process(pl.multiple_of(c * ch, ch))
            return carry
        lax.fori_loop(0, n_chunks, body, 0, unroll=8)


# ---------------------------------------------------------------------------
# wrapper
# ---------------------------------------------------------------------------
def unfold_and_reshape(x, period, *, max_block_bytes=2 << 20,
                       chunk_bytes=128 << 10):
    """Pallas TPU version of UnfoldAndReshape.forward.

    x: (B, L, F) -> (B, L // period, F, period)
    """
    B, L, F = x.shape
    new_len = L // period
    if new_len < 1:
        raise ValueError("pred_len must be >= period")
    # PyTorch's unfold(step=size) silently drops a trailing remainder; match it.
    x = x[:, : new_len * period, :]

    itemsize = jnp.dtype(x.dtype).itemsize
    sublane = {4: 8, 2: 16, 1: 32}.get(itemsize, 8)

    pw = period * F                              # lanes per window
    g = _choose_group(new_len, pw)               # windows per lane-row
    R = new_len // g                             # rows of the folded view
    W = g * pw                                   # lane-folded last dim
    row_pad_bytes = _round_up(W, 128) * itemsize  # padded bytes per VMEM row

    cores = _num_tensorcores()
    r_blk = _choose_rows_per_block(R, row_pad_bytes, sublane, B,
                                   want_steps=2 * cores,
                                   max_block_bytes=max_block_bytes)
    ch = _choose_chunk_rows(r_blk, row_pad_bytes, sublane, chunk_bytes)
    n_steps = R // r_blk

    # Free (contiguous) reshape: each (1, r_blk, W) block is one contiguous
    # HBM slab whose rows land densely on VMEM lanes.
    xg = x.reshape(B, R, W)

    kernel = functools.partial(_unfold_kernel, g=g, period=period, nfeat=F,
                               ch=ch)

    out = pl.pallas_call(
        kernel,
        out_shape=jax.ShapeDtypeStruct((B, R, W), x.dtype),
        grid_spec=pltpu.PrefetchScalarGridSpec(
            num_scalar_prefetch=0,
            grid=(B, n_steps),
            in_specs=[pl.BlockSpec((1, r_blk, W), lambda b, n: (b, n, 0))],
            out_specs=pl.BlockSpec((1, r_blk, W), lambda b, n: (b, n, 0)),
        ),
        compiler_params=pltpu.CompilerParams(
            dimension_semantics=("parallel", "parallel"),
            vmem_limit_bytes=32 << 20,   # covers 2x double-buffered 2 MiB blocks
        ),
        cost_estimate=pl.CostEstimate(
            flops=0,
            transcendentals=0,
            bytes_accessed=2 * B * new_len * pw * itemsize,
        ),
    )(xg)

    # Contiguous (free) reshape back to the module's output layout.
    return out.reshape(B, new_len, F, period)


def unfold_and_reshape_ref(x, period):
    """Pure-JAX reference matching the PyTorch semantics exactly."""
    B, L, F = x.shape
    new_len = L // period
    x = x[:, : new_len * period, :]
    return jnp.transpose(x.reshape(B, new_len, period, F), (0, 1, 3, 2))


if __name__ == "__main__":
    key = jax.random.PRNGKey(0)

    # Case 1: the module's small example shape (period*F < 128, ungrouped path).
    B, L, F, period = 2, 16, 4, 8
    x = jax.random.normal(key, (B, L, F), dtype=jnp.float32)
    out = jax.block_until_ready(unfold_and_reshape(x, period))
    ref = unfold_and_reshape_ref(x, period)
    assert out.shape == (B, L // period, F, period), out.shape
    assert out.dtype == x.dtype
    assert jnp.array_equal(out, ref), "Pallas output does not match reference"

    # Case 2: small shape that exercises the lane-dense grouped path
    # (g=4 windows per row -> 128-lane rows).
    B2, L2, F2, period2 = 2, 128, 4, 8
    x2 = jax.random.normal(jax.random.PRNGKey(0), (B2, L2, F2),
                           dtype=jnp.float32)
    out2 = jax.block_until_ready(unfold_and_reshape(x2, period2))
    ref2 = unfold_and_reshape_ref(x2, period2)
    assert out2.shape == (B2, L2 // period2, F2, period2)
    assert jnp.array_equal(out2, ref2), "grouped path does not match reference"

    print("KERNEL_OK")
</pallas_src>

<mosaic_0001>
module attributes {stable_mosaic.version = 11 : i64} {
  func.func @_unfold_kernel(%arg0: i32, %arg1: i32, %arg2: memref<1x2x32xf32, #tpu.memory_space<vmem>>, %arg3: memref<1x2x32xf32, #tpu.memory_space<vmem>>) attributes {dimension_semantics = [#tpu.dimension_semantics<parallel>, #tpu.dimension_semantics<parallel>], iteration_bounds = array<i64: 2, 1>, scalar_prefetch = 0 : i64, scratch_operands = 0 : i64, tpu.core_type = #tpu.core_type<tc>, window_params = [{transform_indices = @transform_0, window_bounds = array<i64: 1, 2, 32>}, {transform_indices = @transform_1, window_bounds = array<i64: 1, 2, 32>}]} {
    %c0 = arith.constant 0 : index
    %c0_0 = arith.constant 0 : index
    %c0_1 = arith.constant 0 : index
    %0 = vector.load %arg2[%c0, %c0_0, %c0_1] : memref<1x2x32xf32, #tpu.memory_space<vmem>>, vector<1x2x32xf32>
    %1 = vector.shape_cast %0 : vector<1x2x32xf32> to vector<2x32xf32>
    %2 = vector.shape_cast %1 : vector<2x32xf32> to vector<2x8x4xf32>
    %3 = tpu.transpose %2, [0, 2, 1] : vector<2x8x4xf32> -> vector<2x4x8xf32>
    %4 = vector.shape_cast %3 : vector<2x4x8xf32> to vector<2x32xf32>
    %c0_2 = arith.constant 0 : index
    %c0_3 = arith.constant 0 : index
    %c0_4 = arith.constant 0 : index
    %5 = vector.load %arg3[%c0_2, %c0_3, %c0_4] : memref<1x2x32xf32, #tpu.memory_space<vmem>>, vector<1x2x32xf32>
    %6 = vector.shape_cast %5 : vector<1x2x32xf32> to vector<2x32xf32>
    %7 = vector.shape_cast %4 : vector<2x32xf32> to vector<1x2x32xf32>
    tpu.vector_store %arg3[%c0_2, %c0_3, %c0_4], %7 {strides = array<i32>} : memref<1x2x32xf32, #tpu.memory_space<vmem>>, vector<1x2x32xf32>,
    return
  }
  func.func @transform_0(%arg0: i32, %arg1: i32) -> (i32, i32, i32) {
    %c0_i32 = arith.constant 0 : i32
    %c0_i32_0 = arith.constant 0 : i32
    return %arg0, %arg1, %c0_i32 : i32, i32, i32
  }
  func.func @transform_1(%arg0: i32, %arg1: i32) -> (i32, i32, i32) {
    %c0_i32 = arith.constant 0 : i32
    %c0_i32_0 = arith.constant 0 : i32
    return %arg0, %arg1, %c0_i32 : i32, i32, i32
  }
}

</mosaic_0001>

<bundles_post_ra>
// kernel: tpu_custom_call.1
= control target key start
LH: loop header
LB: loop body
LE: loop exit
PB: predicated region body
PF: predicated region fallthrough
CT: control target
= control target key end

     0   :  { %6 = vsyncpa [#allocation3], 0  ;;  %s836_s0 = inlined_call_operand.hbm [shape: f32[2,2,32], index: 0, kind: input, shape index: {}]   ;;  %s837_s1 = inlined_call_operand.hbm [shape: f32[2,2,32], index: 1, kind: output, shape index: {}]  }
   0x1   :  { %8 = vsyncpa [#allocation3 + $0x1], 0 }
   0x2   :  { %9 = vsyncpa [#allocation4], 0 }
   0x3   :  { %11 = vsyncpa [#allocation4 + $0x1], 0  ;;  %s660_s6 = smov 0   ;;  %s662_s7 = smov 0  }
   0x4   :  { %s664_s8 = smov 0   ;;  %s666_s9 = smov 0  }
   0x5   :  { %s668_s10 = smov 0   ;;  %s670_s11 = smov 0  }
   0x6 LB: > { %s433_s12 = sadd.s32 4294967295, %s633_s11   ;;  %s434_s13 = sadd.s32 4294967294, %s633_s11   ;;  %s633_s11 = sphi %s670_s11, %s17_s11   ;;  %s629_s10 = sphi %s668_s10, %s853_s10   ;;  %s625_s9 = sphi %s666_s9, %s852_s9   ;;  %s621_s8 = sphi %s664_s8, %s851_s8   ;;  %s617_s7 = sphi %s662_s7, %s850_s7   ;;  %s613_s6 = sphi %s660_s6, %s849_s6  }
   0x7   : > { %s29_s14 = sadd.s32 1, %s629_s10  ;;  %s38_s15 = sadd.s32 1, %s621_s8 }
   0x8   : > { %p31_p0 = scmp.ge.s32.totalorder %s29_s14, 2  ;;  %p45_p1 = scmp.ne.s32.totalorder %s621_s8, %s617_s7 }
   0x9   : > { %p46_p2 = scmp.eq.s32.totalorder %s633_s11, 0  ;;  %p51_p3 = scmp.ne.s32.totalorder %s617_s7, %s613_s6 }
   0xa   : > { %s855_s14 = smov (%p31_p0, %s29_s14), 0  ;;  %p52_p5 = scmp.eq.s32.totalorder %s433_s12, 0 }
   0xb   : > { %p701_p4 = por %p46_p2, %p45_p1  ;;  %s33_s17 = ssub.s32 %s629_s10, %s855_s14 }
   0xc   : > { %p77_p6 = scmp.eq.s32.totalorder %s433_s12, 1  ;;  %p36_p7 = scmp.eq.s32.totalorder %s33_s17, 0 }
   0xd   : > { %p707_p8 = por %p52_p5, %p51_p3  ;;  %p83_p10 = scmp.eq.s32.totalorder %s434_s13, 1 }
   0xe   : > { %p711_p9 = por %p77_p6, %p45_p1  ;;  %p458_p13 = scmp.lt.s32.totalorder %s633_s11, 2 }
   0xf   : > { %s716_s20 = scalar_select %p36_p7, %s621_s8, %s38_s15  }
  0x10   : > { %s841_s19 = scalar_select %p711_p9, 1, 0 }
  0x11   : > { %p718_p11 = por %p83_p10, %p51_p3  ;;  %s103_s22 = sand.u32 1, %s621_s8  }
  0x12   : > { %s437_s23 = sshll.u32 %s103_s22, 1  ;;  %s438_s24 = sshll.u32 %s629_s10, 5 }
  0x13   : > { %s842_s21 = scalar_select %p718_p11, 1, 0 }
  0x14   : > { %s729_s27 = scalar_lea.hbm %s836_s0, %s438_s24  ;;  %s107_s28 = scalar_lea.vmem [#allocation2], %s437_s23 }
  0x15   : > { %s115_s29 = sshll.u32 %s107_s28, 4  ;;  %p735_p0 = pnand %p458_p13, %p701_p4  ;;  %s731_s29 = int_to_ptr.vmem [resolvable:$true] %s115_s29 }
  0x16   : > { %s104_s2 = scalar_lea.sflag [#allocation3], %s103_s22  ;;  %s521_s3 = scalar_lea.hbm %s729_s27, 32 }
  0x17   : > { %p522_p3 = scmp.ne.s32.totalorder %s729_s27, %s521_s3  ;;  %p523_p5 = pneg %p735_p0 }
  0x18   : > { %s526_s12 = scalar_lea.hbm %s836_s0, 64  ;;  %p527_p4 = scmp.lt.u32.totalorder %s729_s27, %s836_s0 }
  0x19   : > { %p524_p6 = pnand %p523_p5, %p522_p3  ;;  %p528_p10 = scmp.lt.u32.totalorder %s526_s12, %s521_s3 }
  0x1a   : > { %p530_p12 = scmp.lt.u32.totalorder %s521_s3, %s729_s27 }
  0x1b   : > { %p525_p7 = pneg %p524_p6  ;;  %p529_p13 = por %p528_p10, %p527_p4 }
  0x1d   : > { %p531_p1 = por %p530_p12, %p529_p13 }
  0x1f   : > { %p532_p2 = pnand %p531_p1, %p525_p7 }
  0x21   : > { %535 = shalt.err (!%p532_p2)
}
  0x22   : > { %s536_s16 = scalar_lea.vmem %s731_s29, 32  ;;  %s635_s17 = smov [#allocation2]  }
  0x23   : > { %p537_p3 = scmp.ne.s32.totalorder %s731_s29, %s536_s16  ;;  %s541_s22 = sshll.u32 %s635_s17, 4  ;;  %s542_s22 = int_to_ptr.vmem [resolvable:$false] %s541_s22 }
  0x24   : > { %s543_s23 = scalar_lea.vmem %s542_s22, 64  ;;  %p544_p9 = scmp.lt.s32.totalorder %s731_s29, %s542_s22 }
  0x25   : > { %p539_p6 = pnand %p537_p3, %p523_p5  ;;  %p545_p4 = scmp.lt.s32.totalorder %s543_s23, %s536_s16 }
  0x27   : > { %p540_p11 = pneg %p539_p6  ;;  %p546_p10 = por %p545_p4, %p544_p9 }
  0x29   : > { %p547_p12 = pnand %p546_p10, %p540_p11 }
  0x2b   : > { %550 = shalt.err (!%p547_p12)
}
  0x2c   : > { %453 = dma.hbm_to_vmem [thread:$0]  (!%p735_p0), %s729_s27, 32, %s731_s29, %s104_s2  }
  0x2d   : > { %p844_p1 = scmp.lt.s32.totalorder %s633_s11, 3  ;;  %p845_p2 = scmp.ge.s32.totalorder %s633_s11, 1 }
  0x2f   : > { %p121_p5 = pnand %p845_p2, %p844_p1 }
  0x30   : > { %s771_s24 = sand.u32 (!%p121_p5), 1, %s617_s7  }
  0x31   : > { %124 = sbr.rel (%p121_p5) target bundleno = 464 (0x1d0), region = 24  ;;  %s440_s25 = sshll.u32 (!%p121_p5), %s771_s24, 1 }
  0x32   : > { %s127_s26 = scalar_lea.sflag (!%p121_p5), [#allocation3], %s771_s24  ;;  %s130_s28 = scalar_lea.vmem (!%p121_p5), [#allocation2], %s440_s25 }
  0x38   : > { %604 = dma.done.wait (%p707_p8), %s127_s26, 32  }
  0x39   : > { %606 = vsyncadd (%p707_p8), %s127_s26, 4294967264  ;;  %v149_v0 = vld [vmem:[%s130_s28] sm:$0x3]  ;;  %s636_s27 = smov 116   ;;  %s637_s29 = smov 124   ;;  %v176_v5 = vlaneseq  ;;  %v646_v40 = vmov 0.0  }
  0x3a   : > { %157 = vrot.lane.b32.xlu1 %v149_v0, %s636_s27  ;;  %151 = vrot.lane.b32.xlu0 %v149_v0, %s637_s29  ;;  %s638_s30 = smov 112   ;;  %s639_s2 = smov 120   ;;  %v643_v3 = vmov 1983009808   ;;  %v644_v11 = vmov 1934713408  }
  0x3b   : > { %s640_s3 = smov 104   ;;  %s641_s4 = smov 108   ;;  %v174_v4 = vunpack.c.l.s4 %v643_v3  ;;  %v177_v9 = vshrl.u32 %v176_v5, 7  ;;  %v206_v12 = vunpack.c.l.s4 %v644_v11  ;;  %vm330_vm0 = vcmask 64512  }
  0x3c   : > { %s642_s5 = smov 100   ;;  %s645_s18 = smov 16   ;;  %vm332_vm1 = vcmask 130048   ;;  %vm334_vm2 = vcmask 195584   ;;  %vm336_vm3 = vcmask 254976  }
  0x3d   : > { %v175_v8 = vunpack.c.0.s8 %v174_v4  ;;  %v207_v19 = vunpack.c.0.s8 %v206_v12  ;;  %s647_s12 = smov 8   ;;  %s648_s13 = smov 24  }
  0x3e   : > { %160 = vrot.lane.b32.xlu1 %v149_v0, %s638_s30  ;;  %154 = vrot.lane.b32.xlu0 %v149_v0, %s639_s2  ;;  %s443_s15 = sshll.u32 %s625_s9, 5  ;;  %s148_s16 = scalar_lea.vmem [#allocation5], %s440_s25 }
  0x3f   : > { %v178_v15 = vsub.s32 %v175_v8, %v177_v9  ;;  %v210_v26 = vsub.s32 %v207_v19, %v177_v9  ;;  %s353_s17 = sshll.u32 %s148_s16, 4  ;;  %s787_s26 = scalar_lea.hbm %s837_s1, %s443_s15  ;;  %s789_s17 = int_to_ptr.vmem [resolvable:$true] %s353_s17 }
  0x40   : > { %s339_s9 = scalar_lea.sflag [#allocation4], %s771_s24  ;;  %s551_s25 = scalar_lea.vmem %s789_s17, 32 }
  0x41   : > { %p552_p8 = scmp.ne.s32.totalorder %s789_s17, %s551_s25  ;;  %p846_p9 = scmp.ne.s32.totalorder %s841_s19, 0 }
  0x42   : > { %166 = vrot.lane.b32.xlu1 %v149_v0, %s640_s3  ;;  %163 = vrot.lane.b32.xlu0 %v149_v0, %s641_s4  ;;  %s649_s28 = smov [#allocation5]  }
  0x43   : > { %p553_p11 = pnand %p552_p8, %p846_p9  ;;  %s555_s27 = sshll.u32 %s649_s28, 4  ;;  %s556_s27 = int_to_ptr.vmem [resolvable:$false] %s555_s27 }
  0x44   : > { %s557_s29 = scalar_lea.vmem %s556_s27, 64  ;;  %p558_p7 = scmp.lt.s32.totalorder %s789_s17, %s556_s27 }
  0x45   : > { %p554_p0 = pneg %p553_p11  ;;  %p559_p13 = scmp.lt.s32.totalorder %s557_s29, %s551_s25 }
  0x46   : > { %169 = vrot.lane.b32.xlu0 %v149_v0, %s642_s5 }
  0x47   : > { %p560_p3 = por %p559_p13, %p558_p7 }
  0x49   : > { %p561_p6 = pnand %p560_p3, %p554_p0 }
  0xac   : > { %v158_v1 = vpop.permute.xlu1 %157  ;;  %v152_v2 = vpop.permute.xlu0 %151 }
  0xad   : > { %v180_v16 = vcombine.low %v152_v2, %v158_v1 }
  0xaf   : > { %v187_v21 = vrot.slane %v180_v16, %v178_v15 }
  0xb0   : > { %v161_v6 = vpop.permute.xlu1 %160  ;;  %v155_v7 = vpop.permute.xlu0 %154 }
  0xb1   : > { %v172_v10 = vcombine.low %v149_v0, %v155_v7 }
  0xb3   : > { %v179_v17 = vrot.slane %v172_v10, %v178_v15 }
  0xb4   : > { %v167_v13 = vpop.permute.xlu1 %166  ;;  %v164_v14 = vpop.permute.xlu0 %163 }
  0xb5   : > { %v188_v18 = vcombine.low %v161_v6, %v167_v13  ;;  %v204_v23 = vcombine.low %v179_v17, %v187_v21 }
  0xb7   : > { %v195_v24 = vrot.slane %v188_v18, %v178_v15  ;;  %v211_v28 = vrot.slane %v204_v23, %v210_v26 }
  0xb8   : > { %v170_v20 = vpop.permute.xlu0 %169 }
  0xb9   : > { %v196_v22 = vcombine.low %v164_v14, %v170_v20 }
  0xbb   : > { %v203_v25 = vrot.slane %v196_v22, %v178_v15 }
  0xbd   : > { %v212_v27 = vcombine.low %v195_v24, %v203_v25 }
  0xbf   : > { %v219_v29 = vrot.slane %v212_v27, %v210_v26 }
  0xc1   : > { %v221_v30 = vcombine.high %v211_v28, %v219_v29  ;;  %v220_v31 = vcombine.low %v211_v28, %v219_v29 }
  0xc3   : > { %254 = vxpose.xlu0.b32.start.end [1/1] (short) (narrow) %v221_v30, 8  ;;  %222 = vxpose.xlu1.b32.start.end [1/1] (short) (narrow) %v220_v31, 8 }
 0x143   : > { %v270_v32 = vpop.trf.xlu0  ;;  %v238_v33 = vpop.trf.xlu1 }
 0x144   : > { %v299_v34 = vrot.slane %v270_v32, %v178_v15  ;;  %v292_v35 = vrot.slane %v238_v33, %v178_v15 }
 0x146   : > { %v300_v36 = vcombine.low %v292_v35, %v299_v34  ;;  %v301_v37 = vcombine.high %v292_v35, %v299_v34 }
 0x148   : > { %v308_v38 = vrot.slane %v300_v36, %v210_v26  ;;  %v315_v39 = vrot.slane %v301_v37, %v210_v26 }
 0x14a   : > { %323 = vrot.lane.b32.xlu1 %v315_v39, %s645_s18  ;;  %v316_v41 = vcombine.high %v308_v38, %v646_v40  ;;  %v317_v42 = vcombine.high %v315_v39, %v646_v40 }
 0x14c   : > { %319 = vrot.lane.b32.xlu0 %v316_v41, %s647_s12 }
 0x14e   : > { %327 = vrot.lane.b32.xlu1 %v317_v42, %s648_s13 }
 0x1bc   : > { %v324_v43 = vpop.permute.xlu1 %323 }
 0x1be   : > { %v320_v44 = vpop.permute.xlu0 %319 }
 0x1bf   : > { %v331_v45 = vsel %vm330_vm0, %v308_v38, %v320_v44 }
 0x1c0   : > { %v328_v46 = vpop.permute.xlu1 %327  ;;  %v333_v47 = vsel %vm332_vm1, %v331_v45, %v324_v43 }
 0x1c1   : > { %v335_v48 = vsel %vm334_vm2, %v333_v47, %v328_v46 }
 0x1c2   : > { %337 = vst.msk [vmem:[%s148_s16] sm:$0x3] %vm336_vm3, %v335_v48 }
 0x1c3   : > { %564 = shalt.err (!%p561_p6)
}
 0x1c4   : > { %s565_s24 = scalar_lea.hbm %s787_s26, 32  ;;  %s569_s3 = scalar_lea.hbm %s837_s1, 64 }
 0x1c5   : > { %p566_p4 = scmp.ne.s32.totalorder %s787_s26, %s565_s24  ;;  %p570_p1 = scmp.lt.u32.totalorder %s787_s26, %s837_s1 }
 0x1c6   : > { %p571_p2 = scmp.lt.u32.totalorder %s569_s3, %s565_s24  ;;  %p573_p8 = scmp.lt.u32.totalorder %s565_s24, %s787_s26 }
 0x1c7   : > { %p567_p10 = pnand %p566_p4, %p846_p9 }
 0x1c8   : > { %p572_p5 = por %p571_p2, %p570_p1 }
 0x1c9   : > { %p568_p12 = pneg %p567_p10 }
 0x1ca   : > { %p574_p11 = por %p573_p8, %p572_p5 }
 0x1cc   : > { %p575_p0 = pnand %p574_p11, %p568_p12 }
 0x1ce   : > { %578 = shalt.err (!%p575_p0)
}
 0x1cf   : > { %448 = dma.vmem_to_hbm [thread:$0]  (%p846_p9), %s789_s17, 32, %s787_s26, %s339_s9  }
 0x1d0 PF: > { %s365_s18 = sand.u32 1, %s613_s6   ;;  %p847_p7 = scmp.ne.s32.totalorder %s842_s21, 0 }
 0x1d1   : > { %p848_p13 = scmp.ge.s32.totalorder %s633_s11, 2  ;;  %s366_s12 = scalar_lea.sflag [#allocation4], %s365_s18 }
 0x1d3   : > { %p455_p3 = pnand %p848_p13, %p847_p7 }
 0x1d5   : > { %608 = dma.done.wait (!%p455_p3), %s366_s12, 32  }
 0x1d6   : > { %610 = vsyncadd (!%p455_p3), %s366_s12, 4294967264  ;;  %s17_s11 = sadd.s32 1, %s633_s11   ;;  %s849_s6 = smov %s617_s7 }
 0x1d7   : > { %p14_p6 = scmp.ge.s32.totalorder %s17_s11, 4   ;;  %s850_s7 = smov %s621_s8 }
 0x1d8   : > { %s851_s8 = smov %s716_s20  ;;  %s852_s9 = smov %s629_s10 }
 0x1d9   : > { %s853_s10 = smov %s855_s14  ;;  %16 = sbr.rel (!%p14_p6) target bundleno = 6 (0x6), region = 69 }
 0x1e0   :  { %371 = vsyncpa [#allocation3], 1 }
 0x1e1   :  { %373 = vsyncpa [#allocation3 + $0x1], 1 }
 0x1e2   :  { %374 = vsyncpa [#allocation4], 1 }
 0x1e3   :  { %376 = vsyncpa [#allocation4 + $0x1], 1 }

</bundles_post_ra>
